<compile_context>
chip_gen: v6e
topology: v6e:2x2x1
jax: 0.10.0
libtpu: 0.0.40
codegen_flags: <defaults>
</compile_context>

<pallas_src>
import functools
import math

import jax
import jax.numpy as jnp
from jax import lax
from jax.experimental import pallas as pl
from jax.experimental.pallas import tpu as pltpu

_LN_EPS = 1e-5          # torch.nn.LayerNorm default eps
_INV_SQRT2 = 0.7071067811865476


def _round_up(x, m):
    return (x + m - 1) // m * m


# ---------------------------------------------------------------------------
# Pallas kernel: y = LN(patches @ W + b) * gamma + beta  [optionally GELU(y)]
# One row-tile of the im2col matrix per grid step; W / b / gamma / beta are
# VMEM-resident.  LayerNorm statistics are computed over the true channel
# count `n_true` (channels beyond it are zero padding for lane density).
# ---------------------------------------------------------------------------
def _matmul_bias_ln_kernel(p_ref, w_ref, b_ref, g_ref, beta_ref, o_ref,
                           *, gelu, n_true):
    # MXU matmul (bf16 or f32 operands), f32 accumulation.
    y = jnp.dot(p_ref[...], w_ref[...], preferred_element_type=jnp.float32)
    y = y + b_ref[...]                                    # conv bias (f32)

    n_pad = y.shape[-1]
    if n_true == n_pad:
        mu = jnp.mean(y, axis=-1, keepdims=True)
        diff = y - mu
        var = jnp.mean(diff * diff, axis=-1, keepdims=True)
    else:
        # Mask out padded channels so mean/var use only the true N channels.
        lane = lax.broadcasted_iota(jnp.int32, y.shape, 1)
        mask = lane < n_true
        inv_n = 1.0 / float(n_true)
        mu = jnp.sum(jnp.where(mask, y, 0.0), axis=-1, keepdims=True) * inv_n
        d = jnp.where(mask, y - mu, 0.0)
        var = jnp.sum(d * d, axis=-1, keepdims=True) * inv_n

    yn = (y - mu) * lax.rsqrt(var + _LN_EPS)
    yn = yn * g_ref[...] + beta_ref[...]                  # padded gamma/beta = 0
    if gelu:                                              # exact GELU (torch default)
        yn = 0.5 * yn * (1.0 + lax.erf(yn * _INV_SQRT2))
    o_ref[...] = yn.astype(o_ref.dtype)


# ---------------------------------------------------------------------------
# Row-tile size from a VMEM budget (double-buffered in/out tiles + resident W).
# ---------------------------------------------------------------------------
def _choose_tm(M, K, N_pad, in_itemsize, vmem_budget=20 * 1024 * 1024):
    resident = K * N_pad * in_itemsize + 3 * N_pad * 4       # W + b/gamma/beta
    per_row = 2 * (K * in_itemsize + N_pad * 4)              # 2x-buffered in + out
    avail = max(vmem_budget - resident, 1 << 20)
    tm = int(min(512, max(16, avail // per_row)))
    tm = max(16, (tm // 16) * 16)                            # bf16 sublane multiple
    m_aligned = _round_up(M, 16)
    return m_aligned if m_aligned <= tm else tm


def _fused_conv_block(patches, w, b, gamma, beta, *, gelu, out_dtype,
                      compute_dtype):
    """patches: (M, K) im2col matrix, w: (K, N). Returns (M, N) in out_dtype."""
    M, K = patches.shape
    _, N = w.shape
    N_pad = _round_up(N, 128)                        # lane-dense output stores
    in_itemsize = jnp.dtype(compute_dtype).itemsize
    TM = _choose_tm(M, K, N_pad, in_itemsize)
    M_pad = _round_up(M, TM)
    num_tiles = M_pad // TM

    patches_p = patches
    if M_pad != M:
        patches_p = jnp.pad(patches, ((0, M_pad - M), (0, 0)))
    patches_p = patches_p.astype(compute_dtype)
    w_p = jnp.pad(w, ((0, 0), (0, N_pad - N))).astype(compute_dtype)
    b_p = jnp.pad(b, (0, N_pad - N)).reshape(1, N_pad).astype(jnp.float32)
    g_p = jnp.pad(gamma, (0, N_pad - N)).reshape(1, N_pad).astype(jnp.float32)
    beta_p = jnp.pad(beta, (0, N_pad - N)).reshape(1, N_pad).astype(jnp.float32)

    kernel = functools.partial(_matmul_bias_ln_kernel, gelu=gelu, n_true=N)
    out = pl.pallas_call(
        kernel,
        out_shape=jax.ShapeDtypeStruct((M_pad, N_pad), out_dtype),
        grid=(num_tiles,),
        in_specs=[
            pl.BlockSpec((TM, K), lambda i: (i, 0)),       # streamed row tiles
            pl.BlockSpec((K, N_pad), lambda i: (0, 0)),    # resident weights
            pl.BlockSpec((1, N_pad), lambda i: (0, 0)),    # resident bias
            pl.BlockSpec((1, N_pad), lambda i: (0, 0)),    # resident gamma
            pl.BlockSpec((1, N_pad), lambda i: (0, 0)),    # resident beta
        ],
        out_specs=pl.BlockSpec((TM, N_pad), lambda i: (i, 0)),
        compiler_params=pltpu.CompilerParams(
            dimension_semantics=("parallel",),             # megacore on v7x
            vmem_limit_bytes=32 * 1024 * 1024,
        ),
    )(patches_p, w_p, b_p, g_p, beta_p)
    return out[:M, :N]


# ---------------------------------------------------------------------------
# Glue: im2col for a "same"-style Conv2d with kernel (kT, kJ), padding (pT, pJ)
# ---------------------------------------------------------------------------
def _im2col(x, kT, kJ, pT, pJ):
    B, T, J, C = x.shape
    xp = jnp.pad(x, ((0, 0), (pT, pT), (pJ, pJ), (0, 0)))
    T_out = T + 2 * pT - kT + 1
    J_out = J + 2 * pJ - kJ + 1
    rows = []
    for dt in range(kT):
        cols = [xp[:, dt:dt + T_out, dj:dj + J_out, :] for dj in range(kJ)]
        rows.append(jnp.stack(cols, axis=3))             # (B, T_out, J_out, kJ, C)
    patches = jnp.stack(rows, axis=3)                    # (B, T_out, J_out, kT, kJ, C)
    return patches.reshape(B * T_out * J_out, kT * kJ * C), T_out, J_out


# ---------------------------------------------------------------------------
# PatchEmbedding.forward
# ---------------------------------------------------------------------------
def patch_embedding_forward(x, params, *, frame_patch, num_joints, num_patches,
                            compute_dtype=jnp.bfloat16):
    B, T, J, _ = x.shape
    C1 = params["w1"].shape[1]
    d_model = params["w2"].shape[1]
    kT2 = frame_patch // 3

    # Symmetric-"same" conv requirements of the original module.
    assert T % frame_patch == 0 and num_patches == T // frame_patch
    assert frame_patch % 2 == 1 and num_joints % 2 == 1
    assert kT2 % 2 == 1, "frame_patch//3 must be odd for symmetric padding"

    # Conv2d(dim_in -> d_model//2, k=(frame_patch, num_joints)) + LN + GELU
    pT1, pJ1 = (frame_patch - 1) // 2, (num_joints - 1) // 2
    patches1, T1, J1 = _im2col(x, frame_patch, num_joints, pT1, pJ1)
    h = _fused_conv_block(patches1, params["w1"], params["b1"],
                          params["g1"], params["beta1"], gelu=True,
                          out_dtype=compute_dtype, compute_dtype=compute_dtype)
    h = h.reshape(B, T1, J1, C1)

    # Conv2d(d_model//2 -> d_model, k=(frame_patch//3, num_joints)) + LN
    pT2, pJ2 = (kT2 - 1) // 2, (num_joints - 1) // 2
    patches2, T2, J2 = _im2col(h, kT2, num_joints, pT2, pJ2)
    out = _fused_conv_block(patches2, params["w2"], params["b2"],
                            params["g2"], params["beta2"], gelu=False,
                            out_dtype=jnp.float32, compute_dtype=compute_dtype)
    out = out.reshape(B, T2, J2, d_model)

    # rearrange 'b (n tp) p c -> b n tp p c' ; flip over n ; flatten ; concat
    x5 = out.reshape(B, num_patches, frame_patch, J2, d_model)
    rev = jnp.flip(x5, axis=1)
    fwd_flat = x5.reshape(B, -1, d_model)
    rev_flat = rev.reshape(B, -1, d_model)
    return jnp.concatenate([fwd_flat, rev_flat], axis=1)


# ---------------------------------------------------------------------------
# Pure-JAX f32 reference (PyTorch semantics) for correctness checks
# ---------------------------------------------------------------------------
def _reference(x, params, *, frame_patch, num_joints, num_patches, dim_in, d_model):
    C1 = d_model // 2
    kT2 = frame_patch // 3

    def ln(y, g, b):
        mu = jnp.mean(y, -1, keepdims=True)
        var = jnp.mean((y - mu) ** 2, -1, keepdims=True)
        return (y - mu) / jnp.sqrt(var + _LN_EPS) * g + b

    w1 = params["w1"].reshape(frame_patch, num_joints, dim_in, C1)     # HWIO
    h = lax.conv_general_dilated(
        x, w1, (1, 1),
        padding=[((frame_patch - 1) // 2,) * 2, ((num_joints - 1) // 2,) * 2],
        dimension_numbers=("NHWC", "HWIO", "NHWC")) + params["b1"]
    h = ln(h, params["g1"], params["beta1"])
    h = 0.5 * h * (1.0 + lax.erf(h * _INV_SQRT2))

    w2 = params["w2"].reshape(kT2, num_joints, C1, d_model)
    out = lax.conv_general_dilated(
        h, w2, (1, 1),
        padding=[((kT2 - 1) // 2,) * 2, ((num_joints - 1) // 2,) * 2],
        dimension_numbers=("NHWC", "HWIO", "NHWC")) + params["b2"]
    out = ln(out, params["g2"], params["beta2"])

    B = x.shape[0]
    x5 = out.reshape(B, num_patches, frame_patch, num_joints, d_model)
    rev = jnp.flip(x5, 1)
    return jnp.concatenate(
        [x5.reshape(B, -1, d_model), rev.reshape(B, -1, d_model)], axis=1)


if __name__ == "__main__":
    # Small shapes consistent with the module's constraints:
    #   n_frames % frame_patch == 0 ; frame_patch and frame_patch//3 odd.
    B, dim_in, d_model = 2, 3, 32
    frame_patch, num_joints, n_frames = 3, 5, 12
    num_patches = n_frames // frame_patch
    C1, kT2 = d_model // 2, frame_patch // 3

    key = jax.random.PRNGKey(0)
    ks = jax.random.split(key, 9)
    x = jax.random.normal(ks[0], (B, n_frames, num_joints, dim_in), jnp.float32)

    # Deterministic parameter init (conv weights stored in im2col / HWIO order).
    fan1 = dim_in * frame_patch * num_joints
    fan2 = C1 * kT2 * num_joints
    params = dict(
        w1=jax.random.normal(ks[1], (frame_patch * num_joints * dim_in, C1),
                             jnp.float32) / math.sqrt(fan1),
        b1=0.02 * jax.random.normal(ks[2], (C1,), jnp.float32),
        g1=1.0 + 0.05 * jax.random.normal(ks[3], (C1,), jnp.float32),
        beta1=0.02 * jax.random.normal(ks[4], (C1,), jnp.float32),
        w2=jax.random.normal(ks[5], (kT2 * num_joints * C1, d_model),
                             jnp.float32) / math.sqrt(fan2),
        b2=0.02 * jax.random.normal(ks[6], (d_model,), jnp.float32),
        g2=1.0 + 0.05 * jax.random.normal(ks[7], (d_model,), jnp.float32),
        beta2=0.02 * jax.random.normal(ks[8], (d_model,), jnp.float32),
    )

    ref = _reference(x, params, frame_patch=frame_patch, num_joints=num_joints,
                     num_patches=num_patches, dim_in=dim_in, d_model=d_model)
    ref = jax.block_until_ready(ref)

    # Default path: bf16 streaming operands (loose tolerance for bf16 inputs).
    out = patch_embedding_forward(
        x, params, frame_patch=frame_patch, num_joints=num_joints,
        num_patches=num_patches)
    out = jax.block_until_ready(out)
    assert out.shape == (B, 2 * n_frames * num_joints, d_model), out.shape
    err_bf16 = float(jnp.max(jnp.abs(out.astype(jnp.float32) - ref)))
    assert err_bf16 < 8e-2, f"bf16 path mismatch vs reference: {err_bf16}"

    # f32 compute path: tight correctness anchor for the kernel math.
    out32 = patch_embedding_forward(
        x, params, frame_patch=frame_patch, num_joints=num_joints,
        num_patches=num_patches, compute_dtype=jnp.float32)
    out32 = jax.block_until_ready(out32)
    err_f32 = float(jnp.max(jnp.abs(out32 - ref)))
    assert err_f32 < 2e-3, f"f32 path mismatch vs reference: {err_f32}"

    print("KERNEL_OK")
</pallas_src>

<mosaic_0001>
module attributes {stable_mosaic.version = 11 : i64} {
  func.func @_matmul_bias_ln_kernel(%arg0: i32, %arg1: memref<128x45xbf16, #tpu.memory_space<vmem>>, %arg2: memref<45x128xbf16, #tpu.memory_space<vmem>>, %arg3: memref<1x128xf32, #tpu.memory_space<vmem>>, %arg4: memref<1x128xf32, #tpu.memory_space<vmem>>, %arg5: memref<1x128xf32, #tpu.memory_space<vmem>>, %arg6: memref<128x128xbf16, #tpu.memory_space<vmem>>) attributes {dimension_semantics = [#tpu.dimension_semantics<parallel>], iteration_bounds = array<i64: 1>, scalar_prefetch = 0 : i64, scratch_operands = 0 : i64, tpu.core_type = #tpu.core_type<tc>, window_params = [{transform_indices = @transform_0, window_bounds = array<i64: 128, 45>}, {pipeline_mode = #tpu.pipeline_mode<synchronous>, transform_indices = @transform_1, window_bounds = array<i64: 45, 128>}, {pipeline_mode = #tpu.pipeline_mode<synchronous>, transform_indices = @transform_2, window_bounds = array<i64: 1, 128>}, {pipeline_mode = #tpu.pipeline_mode<synchronous>, transform_indices = @transform_3, window_bounds = array<i64: 1, 128>}, {pipeline_mode = #tpu.pipeline_mode<synchronous>, transform_indices = @transform_4, window_bounds = array<i64: 1, 128>}, {transform_indices = @transform_5, window_bounds = array<i64: 128, 128>}]} {
    %c0 = arith.constant 0 : index
    %c0_0 = arith.constant 0 : index
    %0 = vector.load %arg1[%c0, %c0_0] : memref<128x45xbf16, #tpu.memory_space<vmem>>, vector<128x45xbf16>
    %c0_1 = arith.constant 0 : index
    %c0_2 = arith.constant 0 : index
    %1 = vector.load %arg2[%c0_1, %c0_2] : memref<45x128xbf16, #tpu.memory_space<vmem>>, vector<45x128xbf16>
    %cst = arith.constant dense<0.000000e+00> : vector<128x128xf32>
    %2 = tpu.matmul %0, %1, %cst {dimension_numbers = #tpu.dot_dimension_numbers<[1], [0], [0], [1], [0, 0, 1, 1], [], []>} : vector<128x45xbf16>, vector<45x128xbf16>, vector<128x128xf32> -> vector<128x128xf32>
    %c0_3 = arith.constant 0 : index
    %c0_4 = arith.constant 0 : index
    %3 = vector.load %arg3[%c0_3, %c0_4] : memref<1x128xf32, #tpu.memory_space<vmem>>, vector<1x128xf32>
    %4 = vector.broadcast %3 : vector<1x128xf32> to vector<128x128xf32>
    %5 = arith.addf %2, %4 : vector<128x128xf32>
    %6 = tpu.iota {dimensions = array<i32: 1>} : vector<128x128xi32>
    %c16_i32 = arith.constant 16 : i32
    %7 = vector.broadcast %c16_i32 : i32 to vector<128x128xi32>
    %8 = arith.cmpi slt, %6, %7 : vector<128x128xi32>
    %cst_5 = arith.constant 0.000000e+00 : f32
    %9 = vector.broadcast %cst_5 : f32 to vector<128x128xf32>
    %10 = arith.select %8, %5, %9 : vector<128x128xi1>, vector<128x128xf32>
    %cst_6 = arith.constant dense<0.000000e+00> : vector<128xf32>
    %11 = vector.multi_reduction <add>, %10, %cst_6 [1] : vector<128x128xf32> to vector<128xf32>
    %12 = vector.shape_cast %11 : vector<128xf32> to vector<128x1xf32>
    %cst_7 = arith.constant 6.250000e-02 : f32
    %13 = vector.broadcast %cst_7 : f32 to vector<128x1xf32>
    %14 = arith.mulf %12, %13 : vector<128x1xf32>
    %15 = vector.broadcast %14 : vector<128x1xf32> to vector<128x128xf32>
    %16 = arith.subf %5, %15 : vector<128x128xf32>
    %cst_8 = arith.constant 0.000000e+00 : f32
    %17 = vector.broadcast %cst_8 : f32 to vector<128x128xf32>
    %18 = arith.select %8, %16, %17 : vector<128x128xi1>, vector<128x128xf32>
    %19 = arith.mulf %18, %18 : vector<128x128xf32>
    %cst_9 = arith.constant dense<0.000000e+00> : vector<128xf32>
    %20 = vector.multi_reduction <add>, %19, %cst_9 [1] : vector<128x128xf32> to vector<128xf32>
    %21 = vector.shape_cast %20 : vector<128xf32> to vector<128x1xf32>
    %cst_10 = arith.constant 6.250000e-02 : f32
    %22 = vector.broadcast %cst_10 : f32 to vector<128x1xf32>
    %23 = arith.mulf %21, %22 : vector<128x1xf32>
    %24 = vector.broadcast %14 : vector<128x1xf32> to vector<128x128xf32>
    %25 = arith.subf %5, %24 : vector<128x128xf32>
    %cst_11 = arith.constant 9.99999974E-6 : f32
    %26 = vector.broadcast %cst_11 : f32 to vector<128x1xf32>
    %27 = arith.addf %23, %26 : vector<128x1xf32>
    %28 = math.rsqrt %27 : vector<128x1xf32>
    %29 = vector.broadcast %28 : vector<128x1xf32> to vector<128x128xf32>
    %30 = arith.mulf %25, %29 : vector<128x128xf32>
    %c0_12 = arith.constant 0 : index
    %c0_13 = arith.constant 0 : index
    %31 = vector.load %arg4[%c0_12, %c0_13] : memref<1x128xf32, #tpu.memory_space<vmem>>, vector<1x128xf32>
    %32 = vector.broadcast %31 : vector<1x128xf32> to vector<128x128xf32>
    %33 = arith.mulf %30, %32 : vector<128x128xf32>
    %c0_14 = arith.constant 0 : index
    %c0_15 = arith.constant 0 : index
    %34 = vector.load %arg5[%c0_14, %c0_15] : memref<1x128xf32, #tpu.memory_space<vmem>>, vector<1x128xf32>
    %35 = vector.broadcast %34 : vector<1x128xf32> to vector<128x128xf32>
    %36 = arith.addf %33, %35 : vector<128x128xf32>
    %cst_16 = arith.constant 5.000000e-01 : f32
    %37 = vector.broadcast %cst_16 : f32 to vector<128x128xf32>
    %38 = arith.mulf %37, %36 : vector<128x128xf32>
    %cst_17 = arith.constant 0.707106769 : f32
    %39 = vector.broadcast %cst_17 : f32 to vector<128x128xf32>
    %40 = arith.mulf %36, %39 : vector<128x128xf32>
    %41 = math.erf %40 : vector<128x128xf32>
    %cst_18 = arith.constant 1.000000e+00 : f32
    %42 = vector.broadcast %cst_18 : f32 to vector<128x128xf32>
    %43 = arith.addf %42, %41 : vector<128x128xf32>
    %44 = arith.mulf %38, %43 : vector<128x128xf32>
    %45 = arith.truncf %44 : vector<128x128xf32> to vector<128x128xbf16>
    %c0_19 = arith.constant 0 : index
    %c0_20 = arith.constant 0 : index
    %46 = vector.load %arg6[%c0_19, %c0_20] : memref<128x128xbf16, #tpu.memory_space<vmem>>, vector<128x128xbf16>
    tpu.vector_store %arg6[%c0_19, %c0_20], %45 {strides = array<i32>} : memref<128x128xbf16, #tpu.memory_space<vmem>>, vector<128x128xbf16>,
    return
  }
  func.func @transform_0(%arg0: i32) -> (i32, i32) {
    %c0_i32 = arith.constant 0 : i32
    %c0_i32_0 = arith.constant 0 : i32
    return %arg0, %c0_i32 : i32, i32
  }
  func.func @transform_1(%arg0: i32) -> (i32, i32) {
    %c0_i32 = arith.constant 0 : i32
    %c0_i32_0 = arith.constant 0 : i32
    %c0_i32_1 = arith.constant 0 : i32
    return %c0_i32, %c0_i32_0 : i32, i32
  }
  func.func @transform_2(%arg0: i32) -> (i32, i32) {
    %c0_i32 = arith.constant 0 : i32
    %c0_i32_0 = arith.constant 0 : i32
    %c0_i32_1 = arith.constant 0 : i32
    return %c0_i32, %c0_i32_0 : i32, i32
  }
  func.func @transform_3(%arg0: i32) -> (i32, i32) {
    %c0_i32 = arith.constant 0 : i32
    %c0_i32_0 = arith.constant 0 : i32
    %c0_i32_1 = arith.constant 0 : i32
    return %c0_i32, %c0_i32_0 : i32, i32
  }
  func.func @transform_4(%arg0: i32) -> (i32, i32) {
    %c0_i32 = arith.constant 0 : i32
    %c0_i32_0 = arith.constant 0 : i32
    %c0_i32_1 = arith.constant 0 : i32
    return %c0_i32, %c0_i32_0 : i32, i32
  }
  func.func @transform_5(%arg0: i32) -> (i32, i32) {
    %c0_i32 = arith.constant 0 : i32
    %c0_i32_0 = arith.constant 0 : i32
    return %arg0, %c0_i32 : i32, i32
  }
}

</mosaic_0001>

<bundles_post_ra>
// kernel: tpu_custom_call.1
= control target key start
LH: loop header
LB: loop body
LE: loop exit
PB: predicated region body
PF: predicated region fallthrough
CT: control target
= control target key end

     0   :  { %vm133_vm0 = vcmask 1045504   ;;  %vm134_vm1 = vcmask 1046528   ;;  %v911_v1 = vmov 65535   ;;  %vm108_vm2 = vcmask 367616   ;;  %s1277_s0 = inlined_call_operand.vmem [shape: bf16[128,45], index: 0, kind: input, shape index: {}]   ;;  %s1278_s1 = inlined_call_operand.vmem [shape: bf16[45,128], index: 1, kind: input, shape index: {}]   ;;  %s1279_s2 = inlined_call_operand.vmem [shape: f32[1,128], index: 2, kind: input, shape index: {}]   ;;  %s1280_s3 = inlined_call_operand.vmem [shape: f32[1,128], index: 3, kind: input, shape index: {}]   ;;  %s1281_s4 = inlined_call_operand.vmem [shape: f32[1,128], index: 4, kind: input, shape index: {}]   ;;  %s1282_s5 = inlined_call_operand.hbm [shape: bf16[128,128], index: 5, kind: output, shape index: {}]  }
   0x1   :  { %v814_v0 = vld [vmem:[%s1278_s1 + $0x10] sm:$0x7f]   ;;  %v135_v2 = vsel %vm133_vm0, 4294967295, %v911_v1  ;;  %v815_v3 = vld [vmem:[%s1278_s1 + $0x8] sm:$0xff]   ;;  %v817_v5 = vld [vmem:[%s1277_s0] sm:$0xff]  }
   0x2   :  { %v136_v4 = vsel %vm134_vm1, %v135_v2, 0  ;;  %v818_v7 = vld [vmem:[%s1277_s0 + $0x20] sm:$0xff]   ;;  %788 = vmatprep.mubr.msk.bf16.mxu0 %vm108_vm2, %v817_v5 }
   0x3   :  { %v138_v6 = vand.u32 %v814_v0, %v136_v4  ;;  %v816_v8 = vld [vmem:[%s1278_s1] sm:$0xff]   ;;  %796 = vmatprep.mubr.msk.bf16.mxu1 %vm108_vm2, %v818_v7 }
   0x5   :  { %782 = vmatprep.subr.bf16.mxu0 %v138_v6  ;;  %804 = vmatprep.subr.bf16.mxu1 %v138_v6 }
   0x6   :  { %783 = vmatpush3.bf16.msra.mxu0 %v138_v6  ;;  %807 = vmatpush3.bf16.msra.mxu1 %v138_v6 }
   0x7   :  { %784 = vmatprep.subr.bf16.mxu0 %v815_v3  ;;  %805 = vmatprep.subr.bf16.mxu1 %v815_v3 }
   0xa   :  { %785 = vmatpush3.bf16.msra.mxu0 %v815_v3  ;;  %808 = vmatpush3.bf16.msra.mxu1 %v815_v3 }
   0xb   :  { %10 = vsyncpa [#allocation3], 0  ;;  %786 = vmatprep.subr.bf16.mxu0 %v816_v8  ;;  %806 = vmatprep.subr.bf16.mxu1 %v816_v8  ;;  %v819_v9 = vld [vmem:[%s1277_s0 + $0x8] sm:$0xff]   ;;  %v821_v11 = vld [vmem:[%s1277_s0 + $0x10] sm:$0xff]   ;;  %v237_v15 = vlaneseq }
   0xc   :  { %v820_v10 = vld [vmem:[%s1277_s0 + $0x28] sm:$0xff]   ;;  %v823_v12 = vld [vmem:[%s1277_s0 + $0x30] sm:$0xff]   ;;  %v822_v13 = vld [vmem:[%s1277_s0 + $0x18] sm:$0xff]  }
   0xd   :  { %v824_v14 = vld [vmem:[%s1277_s0 + $0x38] sm:$0xff]   ;;  %v986_v16 = vand.u32 127, %v237_v15  ;;  %v670_v17 = vld [vmem:[%s1279_s2] ss:$0 sm:$0xff] }
   0xe   :  { %787 = vmatpush3.bf16.msra.mxu0 %v816_v8  ;;  %809 = vmatpush3.bf16.msra.mxu1 %v816_v8 }
   0xf   :  { %vm239_vm3 = vcmp.lt.s32.totalorder %v986_v16, 16 }
  0x11   :  { %789 = vmatmul.mubr.msk.bf16.vlgmr.msra.gmra.mxu0 %vm108_vm2, %v819_v9  ;;  %797 = vmatmul.mubr.msk.bf16.vlgmr.msra.gmra.mxu1 %vm108_vm2, %v820_v10 }
  0x12   :  { %792 = vmatprep.mubr.msk.bf16.mxu0 %vm108_vm2, %v821_v11  ;;  %800 = vmatprep.mubr.msk.bf16.mxu1 %vm108_vm2, %v823_v12 }
  0x19   :  { %793 = vmatmul.mubr.msk.bf16.gmra.mxu0 %vm108_vm2, %v822_v13  ;;  %801 = vmatmul.mubr.msk.bf16.gmra.mxu1 %vm108_vm2, %v824_v14 }
  0xd1   :  { %v790_v18 = vpop.f32.mrf.mxu0  ;;  %v798_v19 = vpop.f32.mrf.mxu1 }
  0xd2   :  { %v992_v20 = vadd.f32 %v790_v18, %v670_v17  ;;  %v994_v21 = vadd.f32 %v798_v19, %v670_v17 }
  0xd3   :  { %v174_v22 = vpop.f32.mrf.mxu0  ;;  %v206_v23 = vpop.f32.mrf.mxu1 }
  0xd4   :  { %v996_v24 = vadd.f32 %v670_v17, %v174_v22  ;;  %v250_v25 = vsel %vm239_vm3, %v994_v21, 0.0  ;;  %v242_v26 = vsel %vm239_vm3, %v992_v20, 0.0  ;;  %v1006_v32 = vadd.f32 %v670_v17, %v206_v23 }
  0xd5   :  { %276 = vadd.xlane.f32.xlu0 %v250_v25  ;;  %v799_v27 = vpop.f32.mrf.mxu1  ;;  %260 = vadd.xlane.f32.xlu1 %v242_v26  ;;  %v791_v28 = vpop.f32.mrf.mxu0 }
  0xd6   :  { %v1004_v29 = vadd.f32 %v791_v28, %v670_v17  ;;  %v1008_v33 = vadd.f32 %v799_v27, %v670_v17  ;;  %v240_v35 = vsel %vm239_vm3, %v996_v24, 0.0  ;;  %v248_v42 = vsel %vm239_vm3, %v1006_v32, 0.0 }
  0xd7   :  { %v177_v30 = vpop.f32.mrf.mxu0  ;;  %v209_v31 = vpop.f32.mrf.mxu1 }
  0xd8   :  { %v243_v34 = vsel %vm239_vm3, %v1004_v29, 0.0  ;;  %v1016_v39 = vadd.f32 %v670_v17, %v177_v30  ;;  %v1018_v40 = vadd.f32 %v670_v17, %v209_v31  ;;  %v251_v41 = vsel %vm239_vm3, %v1008_v33, 0.0 }
  0xd9   :  { %262 = vadd.xlane.f32.xlu1 %v243_v34  ;;  %256 = vadd.xlane.f32.xlu0 %v240_v35  ;;  %v794_v36 = vpop.f32.mrf.mxu0  ;;  %v802_v37 = vpop.f32.mrf.mxu1 }
  0xda   :  { %v1026_v45 = vadd.f32 %v794_v36, %v670_v17  ;;  %v249_v47 = vsel %vm239_vm3, %v1018_v40, 0.0  ;;  %v241_v48 = vsel %vm239_vm3, %v1016_v39, 0.0  ;;  %v1056_v60 = vadd.f32 %v802_v37, %v670_v17 }
  0xdb   :  { %v190_v38 = vpop.f32.mrf.mxu0  ;;  %v222_v44 = vpop.f32.mrf.mxu1 }
  0xdc   :  { %v246_v52 = vsel %vm239_vm3, %v1026_v45, 0.0  ;;  %v1042_v53 = vadd.f32 %v670_v17, %v190_v38  ;;  %v1046_v56 = vadd.f32 %v670_v17, %v222_v44  ;;  %v254_v1 = vsel %vm239_vm3, %v1056_v60, 0.0 }
  0xdd   :  { %278 = vadd.xlane.f32.xlu1 %v251_v41  ;;  %272 = vadd.xlane.f32.xlu0 %v248_v42  ;;  %v795_v43 = vpop.f32.mrf.mxu0  ;;  %v803_v50 = vpop.f32.mrf.mxu1 }
  0xde   :  { %v1028_v46 = vadd.f32 %v795_v43, %v670_v17  ;;  %v244_v59 = vsel %vm239_vm3, %v1042_v53, 0.0  ;;  %v1058_v61 = vadd.f32 %v803_v50, %v670_v17  ;;  %v252_v63 = vsel %vm239_vm3, %v1046_v56, 0.0 }
  0xdf   :  { %v193_v49 = vpop.f32.mrf.mxu0  ;;  %v225_v55 = vpop.f32.mrf.mxu1 }
  0xe0   :  { %v247_v51 = vsel %vm239_vm3, %v1028_v46, 0.0  ;;  %v1044_v54 = vadd.f32 %v670_v17, %v193_v49  ;;  %v1048_v57 = vadd.f32 %v670_v17, %v225_v55  ;;  %v255_v0 = vsel %vm239_vm3, %v1058_v61, 0.0 }
  0xe1   :  { %274 = vadd.xlane.f32.xlu1 %v249_v47  ;;  %258 = vadd.xlane.f32.xlu0 %v241_v48 }
  0xe2   :  { %v245_v58 = vsel %vm239_vm3, %v1044_v54, 0.0  ;;  %v253_v62 = vsel %vm239_vm3, %v1048_v57, 0.0 }
  0xe5   :  { %270 = vadd.xlane.f32.xlu1 %v247_v51  ;;  %268 = vadd.xlane.f32.xlu0 %v246_v52 }
  0xe9   :  { %266 = vadd.xlane.f32.xlu1 %v245_v58  ;;  %264 = vadd.xlane.f32.xlu0 %v244_v59 }
  0xed   :  { %282 = vadd.xlane.f32.xlu1 %v253_v62  ;;  %280 = vadd.xlane.f32.xlu0 %v252_v63 }
  0xf1   :  { %286 = vadd.xlane.f32.xlu1 %v255_v0  ;;  %284 = vadd.xlane.f32.xlu0 %v254_v1 }
 0x15e   :  { %v277_v2 = vpop.xlane.xlu0 %276  ;;  %v261_v3 = vpop.xlane.xlu1 %260 }
 0x15f   :  { %v298_v4 = vmul.f32 0.0625, %v277_v2  ;;  %v290_v5 = vmul.f32 0.0625, %v261_v3 }
 0x161   :  { %v1073_v6 = vsub.f32 %v994_v21, %v298_v4  ;;  %v1076_v7 = vsub.f32 %v992_v20, %v290_v5 }
 0x162   :  { %v263_v8 = vpop.xlane.xlu1 %262  ;;  %v257_v9 = vpop.xlane.xlu0 %256 }
 0x163   :  { %v291_v10 = vmul.f32 0.0625, %v263_v8  ;;  %v288_v11 = vmul.f32 0.0625, %v257_v9  ;;  %v322_v12 = vsel %vm239_vm3, %v1076_v7, 0.0  ;;  %v330_v17 = vsel %vm239_vm3, %v1073_v6, 0.0 }
 0x164   :  { %v338_v13 = vmul.f32 %v322_v12, %v322_v12  ;;  %v346_v25 = vmul.f32 %v330_v17, %v330_v17 }
 0x165   :  { %v1082_v14 = vsub.f32 %v1004_v29, %v291_v10  ;;  %v1085_v15 = vsub.f32 %v996_v24, %v288_v11 }
 0x166   :  { %v279_v18 = vpop.xlane.xlu1 %278  ;;  %356 = vadd.xlane.f32.xlu0 %v338_v13  ;;  %v273_v19 = vpop.xlane.xlu0 %272 }
 0x167   :  { %v299_v20 = vmul.f32 0.0625, %v279_v18  ;;  %v296_v21 = vmul.f32 0.0625, %v273_v19  ;;  %v323_v22 = vsel %vm239_vm3, %v1082_v14, 0.0  ;;  %v320_v27 = vsel %vm239_vm3, %v1085_v15, 0.0 }
 0x168   :  { %v339_v23 = vmul.f32 %v323_v22, %v323_v22 }
 0x169   :  { %v1094_v26 = vsub.f32 %v1008_v33, %v299_v20  ;;  %v1097_v24 = vsub.f32 %v1006_v32, %v296_v21  ;;  %v336_v33 = vmul.f32 %v320_v27, %v320_v27 }
 0x16a   :  { %v275_v28 = vpop.xlane.xlu1 %274  ;;  %358 = vadd.xlane.f32.xlu1 %v339_v23  ;;  %372 = vadd.xlane.f32.xlu0 %v346_v25  ;;  %v259_v29 = vpop.xlane.xlu0 %258 }
 0x16b   :  { %v297_v30 = vmul.f32 0.0625, %v275_v28  ;;  %v289_v31 = vmul.f32 0.0625, %v259_v29  ;;  %v331_v34 = vsel %vm239_vm3, %v1094_v26, 0.0  ;;  %v328_v37 = vsel %vm239_vm3, %v1097_v24, 0.0 }
 0x16c   :  { %v347_v35 = vmul.f32 %v331_v34, %v331_v34  ;;  %v344_v47 = vmul.f32 %v328_v37, %v328_v37 }
 0x16d   :  { %v1106_v36 = vsub.f32 %v1018_v40, %v297_v30  ;;  %v1109_v32 = vsub.f32 %v1016_v39, %v289_v31 }
 0x16e   :  { %v271_v38 = vpop.xlane.xlu1 %270  ;;  %374 = vadd.xlane.f32.xlu1 %v347_v35  ;;  %352 = vadd.xlane.f32.xlu0 %v336_v33  ;;  %v269_v41 = vpop.xlane.xlu0 %268 }
 0x16f   :  { %v295_v42 = vmul.f32 0.0625, %v271_v38  ;;  %v294_v43 = vmul.f32 0.0625, %v269_v41  ;;  %v321_v44 = vsel %vm239_vm3, %v1109_v32, 0.0  ;;  %v329_v49 = vsel %vm239_vm3, %v1106_v36, 0.0 }
 0x170   :  { %v337_v40 = vmul.f32 %v321_v44, %v321_v44  ;;  %v345_v59 = vmul.f32 %v329_v49, %v329_v49 }
 0x171   :  { %v1118_v48 = vsub.f32 %v1028_v46, %v295_v42  ;;  %v1121_v39 = vsub.f32 %v1026_v45, %v294_v43 }
 0x172   :  { %v267_v50 = vpop.xlane.xlu1 %266  ;;  %368 = vadd.xlane.f32.xlu0 %v344_v47  ;;  %354 = vadd.xlane.f32.xlu1 %v337_v40  ;;  %v265_v51 = vpop.xlane.xlu0 %264 }
 0x173   :  { %v293_v52 = vmul.f32 0.0625, %v267_v50  ;;  %v292_v55 = vmul.f32 0.0625, %v265_v51  ;;  %v326_v58 = vsel %vm239_vm3, %v1121_v39, 0.0  ;;  %v327_v63 = vsel %vm239_vm3, %v1118_v48, 0.0 }
 0x174   :  { %v342_v46 = vmul.f32 %v326_v58, %v326_v58  ;;  %v343_v5 = vmul.f32 %v327_v63, %v327_v63  ;;  %v1171_v63 = vld [vmem:[%s1280_s3] ss:$0 sm:$0xff]  ;;  %s912_s3 = smov [#allocation2]  }
 0x175   :  { %v1130_v62 = vsub.f32 %v1044_v54, %v293_v52  ;;  %v1133_v45 = vsub.f32 %v1042_v53, %v292_v55 }
 0x176   :  { %v283_v0 = vpop.xlane.xlu1 %282  ;;  %370 = vadd.xlane.f32.xlu1 %v345_v59  ;;  %364 = vadd.xlane.f32.xlu0 %v342_v46  ;;  %v281_v1 = vpop.xlane.xlu0 %280 }
 0x177   :  { %v301_v2 = vmul.f32 0.0625, %v283_v0  ;;  %v300_v3 = vmul.f32 0.0625, %v281_v1  ;;  %v324_v4 = vsel %vm239_vm3, %v1133_v45, 0.0  ;;  %v325_v9 = vsel %vm239_vm3, %v1130_v62, 0.0 }
 0x178   :  { %v340_v54 = vmul.f32 %v324_v4, %v324_v4  ;;  %v341_v18 = vmul.f32 %v325_v9, %v325_v9 }
 0x179   :  { %v1142_v8 = vsub.f32 %v1048_v57, %v301_v2  ;;  %v1145_v53 = vsub.f32 %v1046_v56, %v300_v3  ;;  %v1177_v3 = vld [vmem:[%s1281_s4] ss:$0 sm:$0xff]  ;;  %s659_s4 = sshll.u32 %s912_s3, 4  ;;  %s660_s4 = int_to_ptr.vmem [resolvable:$true] %s659_s4 }
 0x17a   :  { %v287_v10 = vpop.xlane.xlu1 %286  ;;  %366 = vadd.xlane.f32.xlu1 %v343_v5  ;;  %360 = vadd.xlane.f32.xlu0 %v340_v54  ;;  %v285_v11 = vpop.xlane.xlu0 %284  ;;  %s889_s18 = scalar_lea.vmem %s660_s4, 1024  ;;  %p894_p1 = scmp.lt.s32.totalorder %s660_s4, %s660_s4 }
 0x17b   :  { %v303_v12 = vmul.f32 0.0625, %v287_v10  ;;  %v302_v13 = vmul.f32 0.0625, %v285_v11  ;;  %v332_v17 = vsel %vm239_vm3, %v1145_v53, 0.0  ;;  %v333_v20 = vsel %vm239_vm3, %v1142_v8, 0.0  ;;  %p890_p0 = scmp.ne.s32.totalorder %s660_s4, %s889_s18  ;;  %p895_p2 = scmp.lt.s32.totalorder %s889_s18, %s889_s18 }
 0x17c   :  { %v348_v57 = vmul.f32 %v332_v17, %v332_v17  ;;  %v349_v22 = vmul.f32 %v333_v20, %v333_v20 }
 0x17d   :  { %v1154_v19 = vsub.f32 %v1058_v61, %v303_v12  ;;  %v1157_v56 = vsub.f32 %v1056_v60, %v302_v13  ;;  %p896_p3 = por %p895_p2, %p894_p1 }
 0x17e   :  { %362 = vadd.xlane.f32.xlu1 %v341_v18  ;;  %376 = vadd.xlane.f32.xlu0 %v348_v57 }
 0x17f   :  { %v334_v21 = vsel %vm239_vm3, %v1157_v56, 0.0  ;;  %v335_v61 = vsel %vm239_vm3, %v1154_v19, 0.0  ;;  %p897_p4 = pnand %p896_p3, %p890_p0 }
 0x180   :  { %v350_v23 = vmul.f32 %v334_v21, %v334_v21  ;;  %v351_v60 = vmul.f32 %v335_v61, %v335_v61 }
 0x182   :  { %378 = vadd.xlane.f32.xlu1 %v349_v22  ;;  %380 = vadd.xlane.f32.xlu0 %v350_v23 }
 0x186   :  { %382 = vadd.xlane.f32.xlu1 %v351_v60 }
 0x1ef   :  { %v357_v25 = vpop.xlane.xlu0 %356 }
 0x1f0   :  { %v386_v27 = vmul.f32 0.0625, %v357_v25 }
 0x1f2   :  { %v402_v28 = vadd.f32 1e-05, %v386_v27 }
 0x1f3   :  { %v359_v29 = vpop.xlane.xlu1 %358  ;;  %v373_v30 = vpop.xlane.xlu0 %372 }
 0x1f4   :  { %825 = vrsqrt.f32 %v402_v28  ;;  %v387_v31 = vmul.f32 0.0625, %v359_v29  ;;  %v394_v34 = vmul.f32 0.0625, %v373_v30 }
 0x1f6   :  { %v403_v35 = vadd.f32 1e-05, %v387_v31  ;;  %v410_v33 = vadd.f32 1e-05, %v394_v34 }
 0x1f7   :  { %v375_v37 = vpop.xlane.xlu1 %374  ;;  %v353_v38 = vpop.xlane.xlu0 %352 }
 0x1f8   :  { %827 = vrsqrt.f32 %v403_v35  ;;  %v395_v41 = vmul.f32 0.0625, %v375_v37  ;;  %v384_v16 = vmul.f32 0.0625, %v353_v38 }
 0x1f9   :  { %829 = vrsqrt.f32 %v410_v33 }
 0x1fa   :  { %v411_v42 = vadd.f32 1e-05, %v395_v41  ;;  %v400_v43 = vadd.f32 1e-05, %v384_v16 }
 0x1fb   :  { %v355_v44 = vpop.xlane.xlu1 %354  ;;  %v369_v47 = vpop.xlane.xlu0 %368 }
 0x1fc   :  { %831 = vrsqrt.f32 %v411_v42  ;;  %v385_v40 = vmul.f32 0.0625, %v355_v44  ;;  %v392_v49 = vmul.f32 0.0625, %v369_v47 }
 0x1fd   :  { %833 = vrsqrt.f32 %v400_v43 }
 0x1fe   :  { %v401_v50 = vadd.f32 1e-05, %v385_v40  ;;  %v408_v51 = vadd.f32 1e-05, %v392_v49 }
 0x1ff   :  { %v371_v52 = vpop.xlane.xlu1 %370  ;;  %v365_v55 = vpop.xlane.xlu0 %364 }
 0x200   :  { %835 = vrsqrt.f32 %v401_v50  ;;  %v393_v58 = vmul.f32 0.0625, %v371_v52  ;;  %v390_v59 = vmul.f32 0.0625, %v365_v55 }
 0x201   :  { %v826_v46 = vpop.eup %825  ;;  %837 = vrsqrt.f32 %v408_v51 }
 0x202   :  { %v434_v0 = vmul.f32 %v826_v46, %v1076_v7  ;;  %v409_v1 = vadd.f32 1e-05, %v393_v58  ;;  %v406_v2 = vadd.f32 1e-05, %v390_v59 }
 0x203   :  { %v367_v4 = vpop.xlane.xlu1 %366  ;;  %v361_v5 = vpop.xlane.xlu0 %360 }
 0x204   :  { %v457_v54 = vmul.f32 %v1171_v63, %v434_v0  ;;  %839 = vrsqrt.f32 %v409_v1  ;;  %v391_v9 = vmul.f32 0.0625, %v367_v4  ;;  %v388_v10 = vmul.f32 0.0625, %v361_v5 }
 0x205   :  { %v828_v11 = vpop.eup %827  ;;  %841 = vrsqrt.f32 %v406_v2 }
 0x206   :  { %v830_v12 = vpop.eup %829  ;;  %v1181_v13 = vadd.f32 %v1177_v3, %v457_v54  ;;  %v435_v7 = vmul.f32 %v828_v11, %v1082_v14  ;;  %v407_v17 = vadd.f32 1e-05, %v391_v9  ;;  %v404_v18 = vadd.f32 1e-05, %v388_v10 }
 0x207   :  { %v442_v57 = vmul.f32 %v830_v12, %v1073_v6  ;;  %v363_v20 = vpop.xlane.xlu1 %362  ;;  %v377_v21 = vpop.xlane.xlu0 %376 }
 0x208   :  { %v512_v22 = vmul.f32 0.70710677, %v1181_v13  ;;  %v458_v23 = vmul.f32 %v1171_v63, %v435_v7  ;;  %843 = vrsqrt.f32 %v407_v17  ;;  %v389_v25 = vmul.f32 0.0625, %v363_v20 }
 0x209   :  { %v832_v61 = vpop.eup %831  ;;  %v465_v60 = vmul.f32 %v1171_v63, %v442_v57  ;;  %845 = vrsqrt.f32 %v404_v18  ;;  %v396_v27 = vmul.f32 0.0625, %v377_v21 }
 0x20a   :  { %v834_v28 = vpop.eup %833  ;;  %847 = verf.f32 %v512_v22  ;;  %v1189_v14 = vadd.f32 %v1177_v3, %v458_v23  ;;  %v443_v6 = vmul.f32 %v832_v61, %v1094_v26  ;;  %v405_v31 = vadd.f32 1e-05, %v389_v25 }
 0x20b   :  { %v1193_v29 = vadd.f32 %v1177_v3, %v465_v60  ;;  %v432_v30 = vmul.f32 %v834_v28, %v1085_v15  ;;  %v379_v34 = vpop.xlane.xlu1 %378  ;;  %v412_v37 = vadd.f32 1e-05, %v396_v27  ;;  %v381_v41 = vpop.xlane.xlu0 %380 }
 0x20c   :  { %v513_v35 = vmul.f32 0.70710677, %v1189_v14  ;;  %v466_v33 = vmul.f32 %v1171_v63, %v443_v6  ;;  %v397_v38 = vmul.f32 0.0625, %v379_v34  ;;  %849 = vrsqrt.f32 %v405_v31 }
 0x20d   :  { %v836_v16 = vpop.eup %835  ;;  %v520_v42 = vmul.f32 0.70710677, %v1193_v29  ;;  %v455_v43 = vmul.f32 %v1171_v63, %v432_v30  ;;  %v398_v50 = vmul.f32 0.0625, %v381_v41  ;;  %v496_v30 = vmul.f32 0.5, %v1181_v13 }
 0x20e   :  { %v838_v26 = vpop.eup %837  ;;  %851 = verf.f32 %v513_v35  ;;  %v1201_v44 = vadd.f32 %v1177_v3, %v466_v33  ;;  %v433_v15 = vmul.f32 %v836_v16, %v1109_v32  ;;  %v413_v47 = vadd.f32 1e-05, %v397_v38 }
 0x20f   :  { %853 = verf.f32 %v520_v42  ;;  %v1205_v40 = vadd.f32 %v1177_v3, %v455_v43  ;;  %v440_v49 = vmul.f32 %v838_v26, %v1097_v24  ;;  %v383_v55 = vpop.xlane.xlu1 %382  ;;  %v414_v1 = vadd.f32 1e-05, %v398_v50 }
 0x210   :  { %v521_v51 = vmul.f32 0.70710677, %v1201_v44  ;;  %v456_v52 = vmul.f32 %v1171_v63, %v433_v15  ;;  %855 = vrsqrt.f32 %v412_v37  ;;  %v399_v5 = vmul.f32 0.0625, %v383_v55 }
 0x211   :  { %v840_v58 = vpop.eup %839  ;;  %v510_v59 = vmul.f32 0.70710677, %v1205_v40  ;;  %v463_v46 = vmul.f32 %v1171_v63, %v440_v49  ;;  %857 = vrsqrt.f32 %v413_v47  ;;  %v497_v31 = vmul.f32 0.5, %v1189_v14 }
 0x212   :  { %v842_v32 = vpop.eup %841  ;;  %859 = verf.f32 %v521_v51  ;;  %v1213_v0 = vadd.f32 %v1177_v3, %v456_v52  ;;  %v441_v24 = vmul.f32 %v840_v58, %v1106_v36  ;;  %v415_v7 = vadd.f32 1e-05, %v399_v5 }
 0x213   :  { %861 = verf.f32 %v510_v59  ;;  %v1217_v2 = vadd.f32 %v1177_v3, %v463_v46  ;;  %v438_v4 = vmul.f32 %v842_v32, %v1121_v39  ;;  %v504_v13 = vmul.f32 0.5, %v1193_v29 }
 0x214   :  { %v511_v54 = vmul.f32 0.70710677, %v1213_v0  ;;  %v464_v9 = vmul.f32 %v1171_v63, %v441_v24  ;;  %863 = vrsqrt.f32 %v414_v1  ;;  %v505_v50 = vmul.f32 0.5, %v1201_v44 }
 0x215   :  { %v844_v10 = vpop.eup %843  ;;  %v518_v11 = vmul.f32 0.70710677, %v1217_v2  ;;  %v461_v12 = vmul.f32 %v1171_v63, %v438_v4  ;;  %v494_v1 = vmul.f32 0.5, %v1205_v40 }
 0x216   :  { %v846_v36 = vpop.eup %845  ;;  %865 = verf.f32 %v511_v54  ;;  %v1225_v17 = vadd.f32 %v1177_v3, %v464_v9  ;;  %v439_v18 = vmul.f32 %v844_v10, %v1118_v48  ;;  %v495_v54 = vmul.f32 0.5, %v1213_v0 }
 0x217   :  { %v848_v39 = vpop.eup %847  ;;  %867 = verf.f32 %v518_v11  ;;  %v1229_v57 = vadd.f32 %v1177_v3, %v461_v12  ;;  %v436_v20 = vmul.f32 %v846_v36, %v1133_v45  ;;  %v502_v0 = vmul.f32 0.5, %v1217_v2 }
 0x218   :  { %v519_v21 = vmul.f32 0.70710677, %v1225_v17  ;;  %v462_v22 = vmul.f32 %v1171_v63, %v439_v18  ;;  %869 = vrsqrt.f32 %v415_v7  ;;  %v544_v25 = vadd.f32 1.0, %v848_v39 }
 0x219   :  { %v516_v23 = vmul.f32 0.70710677, %v1229_v57  ;;  %v459_v61 = vmul.f32 %v1171_v63, %v436_v20  ;;  %v850_v60 = vpop.eup %849 }
 0x21a   :  { %871 = verf.f32 %v519_v21  ;;  %v1237_v48 = vadd.f32 %v1177_v3, %v462_v22  ;;  %v437_v45 = vmul.f32 %v850_v60, %v1130_v62  ;;  %v560_v42 = vmul.f32 %v544_v25, %v496_v30 }
 0x21b   :  { %v852_v27 = vpop.eup %851  ;;  %873 = verf.f32 %v516_v23  ;;  %v1240_v28 = vadd.f32 %v1177_v3, %v459_v61  ;;  %v503_v23 = vmul.f32 0.5, %v1225_v17 }
 0x21c   :  { %v854_v6 = vpop.eup %853  ;;  %v545_v34 = vadd.f32 1.0, %v852_v27  ;;  %v517_v35 = vmul.f32 0.70710677, %v1237_v48  ;;  %v460_v41 = vmul.f32 %v1171_v63, %v437_v45  ;;  %v501_v2 = vmul.f32 0.5, %v1237_v48 }
 0x21d   :  { %v856_v33 = vpop.eup %855  ;;  %v552_v37 = vadd.f32 1.0, %v854_v6  ;;  %v514_v38 = vmul.f32 0.70710677, %v1240_v28 }
 0x21e   :  { %v858_v16 = vpop.eup %857  ;;  %v561_v43 = vmul.f32 %v545_v34, %v497_v31  ;;  %875 = verf.f32 %v517_v35  ;;  %v444_v62 = vmul.f32 %v856_v33, %v1145_v53  ;;  %v1251_v14 = vadd.f32 %v1177_v3, %v460_v41 }
 0x21f   :  { %v860_v26 = vpop.eup %859  ;;  %877 = verf.f32 %v514_v38  ;;  %v445_v15 = vmul.f32 %v858_v16, %v1142_v8  ;;  %v568_v58 = vmul.f32 %v552_v37, %v504_v13  ;;  %v500_v35 = vmul.f32 0.5, %v1229_v57 }
 0x220   :  { %v862_v47 = vpop.eup %861  ;;  %v732_v49 = vpack.c.bf16 %v561_v43, %v560_v42  ;;  %v553_v51 = vadd.f32 1.0, %v860_v26  ;;  %v467_v52 = vmul.f32 %v1171_v63, %v444_v62  ;;  %v515_v53 = vmul.f32 0.70710677, %v1251_v14 }
 0x221   :  { %v864_v55 = vpop.eup %863  ;;  %v468_v59 = vmul.f32 %v1171_v63, %v445_v15  ;;  %v542_v46 = vadd.f32 1.0, %v862_v47  ;;  %v498_v42 = vmul.f32 0.5, %v1240_v28  ;;  %v499_v43 = vmul.f32 0.5, %v1251_v14 }
 0x222   :  { %764 = vst [vmem:[#allocation2 + $0x8] sm:$0xff] %v732_v49   ;;  %v569_v29 = vmul.f32 %v553_v51, %v505_v50  ;;  %v490_v32 = vadd.f32 %v1177_v3, %v467_v52  ;;  %v446_v8 = vmul.f32 %v864_v55, %v1157_v56  ;;  %879 = verf.f32 %v515_v53 }
 0x223   :  { %v866_v24 = vpop.eup %865  ;;  %v491_v44 = vadd.f32 %v1177_v3, %v468_v59  ;;  %v558_v36 = vmul.f32 %v542_v46, %v494_v1 }
 0x224   :  { %v868_v4 = vpop.eup %867  ;;  %v752_v5 = vpack.c.bf16 %v569_v29, %v568_v58  ;;  %v543_v9 = vadd.f32 1.0, %v866_v24  ;;  %v522_v10 = vmul.f32 0.70710677, %v490_v32  ;;  %v469_v12 = vmul.f32 %v1171_v63, %v446_v8 }
 0x225   :  { %v523_v11 = vmul.f32 0.70710677, %v491_v44  ;;  %v870_v7 = vpop.eup %869  ;;  %v550_v56 = vadd.f32 1.0, %v868_v4  ;;  %v506_v47 = vmul.f32 0.5, %v490_v32  ;;  %v507_v49 = vmul.f32 0.5, %v491_v44 }
 0x226   :  { %768 = vst [vmem:[#allocation2 + $0x28] sm:$0xff] %v752_v5   ;;  %v559_v18 = vmul.f32 %v543_v9, %v495_v54  ;;  %881 = verf.f32 %v522_v10  ;;  %v492_v40 = vadd.f32 %v1177_v3, %v469_v12  ;;  %v447_v20 = vmul.f32 %v870_v7, %v1154_v19 }
 0x227   :  { %v872_v39 = vpop.eup %871  ;;  %883 = verf.f32 %v523_v11  ;;  %v566_v27 = vmul.f32 %v550_v56, %v502_v0 }
 0x228   :  { %v874_v21 = vpop.eup %873  ;;  %v727_v22 = vpack.c.bf16 %v559_v18, %v558_v36  ;;  %v551_v61 = vadd.f32 1.0, %v872_v39  ;;  %v524_v60 = vmul.f32 0.70710677, %v492_v40  ;;  %v470_v25 = vmul.f32 %v1171_v63, %v447_v20 }
 0x229   :  { %v548_v6 = vadd.f32 1.0, %v874_v21  ;;  %v508_v14 = vmul.f32 0.5, %v492_v40 }
 0x22a   :  { %728 = vst [vmem:[#allocation2] sm:$0xff] %v727_v22   ;;  %v567_v45 = vmul.f32 %v551_v61, %v503_v23  ;;  %885 = verf.f32 %v524_v60  ;;  %v493_v31 = vadd.f32 %v1177_v3, %v470_v25 }
 0x22b   :  { %v876_v30 = vpop.eup %875  ;;  %v564_v37 = vmul.f32 %v548_v6, %v500_v35 }
 0x22c   :  { %v878_v34 = vpop.eup %877  ;;  %v747_v19 = vpack.c.bf16 %v567_v45, %v566_v27  ;;  %v549_v33 = vadd.f32 1.0, %v876_v30  ;;  %v525_v17 = vmul.f32 0.70710677, %v493_v31  ;;  %v509_v59 = vmul.f32 0.5, %v493_v31 }
 0x22d   :  { %v546_v63 = vadd.f32 1.0, %v878_v34 }
 0x22e   :  { %767 = vst [vmem:[#allocation2 + $0x20] sm:$0xff] %v747_v19   ;;  %v565_v38 = vmul.f32 %v549_v33, %v501_v2  ;;  %887 = verf.f32 %v525_v17 }
 0x22f   :  { %v880_v41 = vpop.eup %879  ;;  %v562_v26 = vmul.f32 %v546_v63, %v498_v42 }
 0x230   :  { %v742_v16 = vpack.c.bf16 %v565_v38, %v564_v37  ;;  %v547_v3 = vadd.f32 1.0, %v880_v41 }
 0x232   :  { %766 = vst [vmem:[#allocation2 + $0x18] sm:$0xff] %v742_v16   ;;  %v563_v57 = vmul.f32 %v547_v3, %v499_v43 }
 0x233   :  { %v882_v62 = vpop.eup %881 }
 0x234   :  { %v884_v13 = vpop.eup %883  ;;  %v554_v48 = vadd.f32 1.0, %v882_v62  ;;  %v737_v15 = vpack.c.bf16 %v563_v57, %v562_v26 }
 0x235   :  { %v555_v50 = vadd.f32 1.0, %v884_v13 }
 0x236   :  { %765 = vst [vmem:[#allocation2 + $0x10] sm:$0xff] %v737_v15   ;;  %v570_v51 = vmul.f32 %v554_v48, %v506_v47 }
 0x237   :  { %v571_v52 = vmul.f32 %v555_v50, %v507_v49  ;;  %v886_v55 = vpop.eup %885 }
 0x238   :  { %v556_v28 = vadd.f32 1.0, %v886_v55 }
 0x239   :  { %v757_v58 = vpack.c.bf16 %v571_v52, %v570_v51 }
 0x23a   :  { %v572_v46 = vmul.f32 %v556_v28, %v508_v14 }
 0x23b   :  { %769 = vst [vmem:[#allocation2 + $0x30] sm:$0xff] %v757_v58   ;;  %v888_v53 = vpop.eup %887 }
 0x23c   :  { %v557_v29 = vadd.f32 1.0, %v888_v53 }
 0x23e   :  { %v573_v8 = vmul.f32 %v557_v29, %v509_v59 }
 0x240   :  { %v762_v24 = vpack.c.bf16 %v573_v8, %v572_v46 }
 0x242   :  { %770 = vst [vmem:[#allocation2 + $0x38] sm:$0xff] %v762_v24  }
 0x243   :  { %900 = shalt.err (!%p897_p4)
}
 0x244   :  { %s913_s19 = smov 64   ;;  %s914_s20 = smov 4  }
 0x245   :  { %665 = dma.vmem_to_hbm [thread:$0]  %s660_s4, 1024, %s1282_s5, [#allocation3], %s913_s19, %s913_s19, %s914_s20  }
 0x246   :  { %909 = dma.done.wait [#allocation3], 1024  }
 0x247   :  { %910 = vsyncadd [#allocation3], 4294966272 }
 0x248   :  { %669 = vsyncpa [#allocation3], 1 }

</bundles_post_ra>
